<compile_context>
chip_gen: v6e
topology: v6e:2x2x1
jax: 0.10.0
libtpu: 0.0.40
codegen_flags: <defaults>
</compile_context>

<pallas_src>
import functools

import jax
import jax.numpy as jnp
from jax.experimental import pallas as pl
from jax.experimental.pallas import tpu as pltpu


def _round_up(x, m):
    return ((x + m - 1) // m) * m


def _weighted_codebook_kernel(w_ref, tok_ref, tab_ref, out_ref, *, nq, v_pad):
    # w_ref  : SMEM (nq,)              f32    per-codebook weights
    # tok_ref: VMEM (tile_m, nq)       int32  one token per codebook per row
    # tab_ref: VMEM (nq*v_pad, d_pad)  f32/bf16 raw stacked tables (resident)
    # out_ref: VMEM (tile_m, d_pad)    f32
    tile_m = tok_ref.shape[0]
    d_pad = out_ref.shape[1]
    toks = tok_ref[...]                                            # (Mt, nq)
    col_ids = jax.lax.broadcasted_iota(jnp.int32, (tile_m, v_pad), 1)
    oh_dtype = tab_ref.dtype   # 0/1 one-hot is exact in bf16 as well as f32

    if nq == 1:
        # Reference module bypasses the weights entirely for nq == 1.
        onehot = (toks[:, 0:1] == col_ids).astype(oh_dtype)
        out_ref[...] = jnp.dot(onehot, tab_ref[...],
                               preferred_element_type=jnp.float32
                               ).astype(out_ref.dtype)
        return

    # Static unroll over codebooks: per-codebook one-hot stays only V lanes
    # wide, each partial dot is accumulated and weighted in f32.
    acc = jnp.zeros((tile_m, d_pad), jnp.float32)
    for i in range(nq):
        onehot = (toks[:, i:i + 1] == col_ids).astype(oh_dtype)
        part = jnp.dot(onehot, tab_ref[pl.ds(i * v_pad, v_pad), :],
                       preferred_element_type=jnp.float32)
        acc = acc + w_ref[i] * part
    out_ref[...] = acc.astype(out_ref.dtype)


def weighted_codebook_embedding(tokens, tables, weights, *, tile_m=256):
    """tokens: (B, nq*T) int; tables: (nq, V, D) f32/bf16; weights: (nq,) f32.

    Returns (B, T, D) f32 == torch.einsum('i,ibtd->btd', weights, stacked_embs)
    (for nq == 1 the weights are bypassed, exactly like the reference module).
    """
    B, total = tokens.shape
    nq, V, D = tables.shape
    assert total % nq == 0, f"token length {total} must be divisible by nq={nq}"
    T = total // nq
    M = B * T

    # (B, nq, T) -> (B, T, nq) -> (M, nq): rows on sublanes, codebooks on lanes.
    toks = (tokens.astype(jnp.int32)
            .reshape(B, nq, T)
            .transpose(0, 2, 1)
            .reshape(M, nq))

    # Pad V / D up to lane multiples (128) only when necessary.  Padded vocab
    # rows are never selected by in-range tokens; padded D columns are sliced
    # off after the kernel.  Table dtype is passed through unchanged.
    V_pad = _round_up(V, 128)
    D_pad = _round_up(D, 128)
    tab = tables
    if (V_pad, D_pad) != (V, D):
        tab = jnp.pad(tab, ((0, 0), (0, V_pad - V), (0, D_pad - D)))
    tab = tab.reshape(nq * V_pad, D_pad)

    w = weights.astype(jnp.float32).reshape(nq)

    # Row tile: multiple of 8 sublanes, at most tile_m; keep >=2 grid steps
    # when there is enough work so the "parallel" axis can shard across both
    # TensorCores on v7x.  Pad M up with token id 0 (rows discarded afterwards).
    M8 = _round_up(max(M, 1), 8)
    tile_m = max(8, min(tile_m, M8))
    if M8 // tile_m < 2 and M8 >= 16:
        tile_m = _round_up(M8 // 2, 8)
    M_pad = _round_up(M, tile_m)
    if M_pad != M:
        toks = jnp.pad(toks, ((0, M_pad - M), (0, 0)))

    # VMEM budget: resident table + double-buffered token/output tiles + the
    # live (tile_m, V_pad) one-hot, with headroom.  Floor at the 16 MiB v5e
    # default, cap at v7x's 64 MiB physical VMEM.
    isz = jnp.dtype(tab.dtype).itemsize
    vmem_bytes = (nq * V_pad * D_pad * isz          # resident table (1 copy)
                  + 2 * tile_m * nq * 4             # token tiles (dbl-buffered)
                  + 2 * tile_m * D_pad * 4          # output tiles (dbl-buffered)
                  + tile_m * V_pad * isz)           # live one-hot
    vmem_limit = min(64 << 20, max(16 << 20, int(vmem_bytes * 1.5) + (2 << 20)))

    kernel = functools.partial(_weighted_codebook_kernel, nq=nq, v_pad=V_pad)

    out = pl.pallas_call(
        kernel,
        out_shape=jax.ShapeDtypeStruct((M_pad, D_pad), jnp.float32),
        grid=(M_pad // tile_m,),
        in_specs=[
            # codebook weights: tiny, scalar-indexed -> SMEM, whole array
            pl.BlockSpec(memory_space=pltpu.MemorySpace.SMEM),
            # token rows: pipelined per row-tile
            pl.BlockSpec((tile_m, nq), lambda m: (m, 0)),
            # raw stacked tables: constant across the grid -> one copy
            # resident in VMEM (no double-buffering).
            pl.BlockSpec(memory_space=pltpu.MemorySpace.VMEM),
        ],
        out_specs=pl.BlockSpec((tile_m, D_pad), lambda m: (m, 0)),
        compiler_params=pltpu.CompilerParams(
            dimension_semantics=("parallel",),
            vmem_limit_bytes=vmem_limit),
    )(w, toks, tab)

    return out[:M, :D].reshape(B, T, D)


def _reference(tokens, tables, weights):
    B, total = tokens.shape
    nq, V, D = tables.shape
    T = total // nq
    toks = tokens.reshape(B, nq, T)
    embs = jnp.stack([tables[i][toks[:, i, :]] for i in range(nq)], axis=0)
    if nq == 1:
        return embs[0]
    return jnp.einsum("i,ibtd->btd", weights, embs)


if __name__ == "__main__":
    # Module hyper-parameters (small, consistent with the forward()):
    nq = 4          # number of codebooks
    token_size = 256
    embed_dim = 128
    B = 2
    T = 8           # token_length per codebook -> tokens has nq*T = 32 cols

    key = jax.random.PRNGKey(0)
    k_tok, k_emb, k_tok1, k_emb1 = jax.random.split(key, 4)

    # Deterministic init (nn.Embedding default: N(0,1); weights = 1/nq)
    tables = jax.random.normal(k_emb, (nq, token_size, embed_dim), jnp.float32)
    weights = jnp.ones((nq,), jnp.float32) / nq
    tokens = jax.random.randint(k_tok, (B, nq * T), 0, token_size, jnp.int32)

    out = jax.block_until_ready(
        weighted_codebook_embedding(tokens, tables, weights))
    ref = _reference(tokens, tables, weights)
    assert out.shape == (B, T, embed_dim), out.shape
    assert jnp.allclose(out, ref, atol=1e-5, rtol=1e-5), "mismatch vs reference"

    # nq == 1 path (weights bypassed, like the reference module)
    tables1 = jax.random.normal(k_emb1, (1, token_size, embed_dim), jnp.float32)
    tokens1 = jax.random.randint(k_tok1, (B, T), 0, token_size, jnp.int32)
    out1 = jax.block_until_ready(
        weighted_codebook_embedding(tokens1, tables1, jnp.ones((1,), jnp.float32)))
    ref1 = _reference(tokens1, tables1, jnp.ones((1,), jnp.float32))
    assert jnp.allclose(out1, ref1, atol=1e-5, rtol=1e-5), "mismatch (nq=1)"

    # Optional bf16 table storage: bf16 MXU path, ~1e-3 drift vs f32 reference
    # (one-hot and weights stay exact; accumulation is f32).
    out_bf16 = jax.block_until_ready(
        weighted_codebook_embedding(tokens, tables.astype(jnp.bfloat16), weights))
    assert jnp.allclose(out_bf16, ref, atol=6e-2, rtol=0), "mismatch (bf16 table)"

    print("KERNEL_OK")
</pallas_src>

<mosaic_0001>
module attributes {stable_mosaic.version = 11 : i64} {
  func.func @_weighted_codebook_kernel(%arg0: i32, %arg1: memref<4xf32, #tpu.memory_space<smem>>, %arg2: memref<8x4xi32, #tpu.memory_space<vmem>>, %arg3: memref<1024x128xf32, #tpu.memory_space<vmem>>, %arg4: memref<8x128xf32, #tpu.memory_space<vmem>>) attributes {dimension_semantics = [#tpu.dimension_semantics<parallel>], iteration_bounds = array<i64: 2>, scalar_prefetch = 0 : i64, scratch_operands = 0 : i64, tpu.core_type = #tpu.core_type<tc>, window_params = [{transform_indices = @transform_0, window_bounds = array<i64: 4>}, {transform_indices = @transform_1, window_bounds = array<i64: 8, 4>}, {pipeline_mode = #tpu.pipeline_mode<synchronous>, transform_indices = @transform_2, window_bounds = array<i64: 1024, 128>}, {transform_indices = @transform_3, window_bounds = array<i64: 8, 128>}]} {
    %c0 = arith.constant 0 : index
    %c0_0 = arith.constant 0 : index
    %0 = vector.load %arg2[%c0, %c0_0] : memref<8x4xi32, #tpu.memory_space<vmem>>, vector<8x4xi32>
    %1 = tpu.iota {dimensions = array<i32: 1>} : vector<8x256xi32>
    %cst = arith.constant 0.000000e+00 : f32
    %2 = vector.broadcast %cst : f32 to vector<8x128xf32>
    %3 = vector.extract_strided_slice %0 {offsets = [0, 0], sizes = [8, 1], strides = [1, 1]} : vector<8x4xi32> to vector<8x1xi32>
    %4 = vector.broadcast %3 : vector<8x1xi32> to vector<8x256xi32>
    %5 = arith.cmpi eq, %4, %1 : vector<8x256xi32>
    %6 = arith.extui %5 : vector<8x256xi1> to vector<8x256xi32>
    %7 = arith.sitofp %6 : vector<8x256xi32> to vector<8x256xf32>
    %c0_1 = arith.constant 0 : index
    %c0_2 = arith.constant 0 : index
    %8 = vector.load %arg3[%c0_1, %c0_2] : memref<1024x128xf32, #tpu.memory_space<vmem>>, vector<256x128xf32>
    %cst_3 = arith.constant dense<0.000000e+00> : vector<8x128xf32>
    %9 = tpu.matmul %7, %8, %cst_3 {dimension_numbers = #tpu.dot_dimension_numbers<[1], [0], [0], [1], [0, 0, 1, 1], [], []>} : vector<8x256xf32>, vector<256x128xf32>, vector<8x128xf32> -> vector<8x128xf32>
    %c0_4 = arith.constant 0 : index
    %10 = memref.load %arg1[%c0_4] : memref<4xf32, #tpu.memory_space<smem>>
    %11 = vector.broadcast %10 : f32 to vector<8x128xf32>
    %12 = arith.mulf %11, %9 : vector<8x128xf32>
    %13 = arith.addf %2, %12 : vector<8x128xf32>
    %14 = vector.extract_strided_slice %0 {offsets = [0, 1], sizes = [8, 1], strides = [1, 1]} : vector<8x4xi32> to vector<8x1xi32>
    %15 = vector.broadcast %14 : vector<8x1xi32> to vector<8x256xi32>
    %16 = arith.cmpi eq, %15, %1 : vector<8x256xi32>
    %17 = arith.extui %16 : vector<8x256xi1> to vector<8x256xi32>
    %18 = arith.sitofp %17 : vector<8x256xi32> to vector<8x256xf32>
    %c256 = arith.constant 256 : index
    %c0_5 = arith.constant 0 : index
    %19 = vector.load %arg3[%c256, %c0_5] : memref<1024x128xf32, #tpu.memory_space<vmem>>, vector<256x128xf32>
    %cst_6 = arith.constant dense<0.000000e+00> : vector<8x128xf32>
    %20 = tpu.matmul %18, %19, %cst_6 {dimension_numbers = #tpu.dot_dimension_numbers<[1], [0], [0], [1], [0, 0, 1, 1], [], []>} : vector<8x256xf32>, vector<256x128xf32>, vector<8x128xf32> -> vector<8x128xf32>
    %c1 = arith.constant 1 : index
    %21 = memref.load %arg1[%c1] : memref<4xf32, #tpu.memory_space<smem>>
    %22 = vector.broadcast %21 : f32 to vector<8x128xf32>
    %23 = arith.mulf %22, %20 : vector<8x128xf32>
    %24 = arith.addf %13, %23 : vector<8x128xf32>
    %25 = vector.extract_strided_slice %0 {offsets = [0, 2], sizes = [8, 1], strides = [1, 1]} : vector<8x4xi32> to vector<8x1xi32>
    %26 = vector.broadcast %25 : vector<8x1xi32> to vector<8x256xi32>
    %27 = arith.cmpi eq, %26, %1 : vector<8x256xi32>
    %28 = arith.extui %27 : vector<8x256xi1> to vector<8x256xi32>
    %29 = arith.sitofp %28 : vector<8x256xi32> to vector<8x256xf32>
    %c512 = arith.constant 512 : index
    %c0_7 = arith.constant 0 : index
    %30 = vector.load %arg3[%c512, %c0_7] : memref<1024x128xf32, #tpu.memory_space<vmem>>, vector<256x128xf32>
    %cst_8 = arith.constant dense<0.000000e+00> : vector<8x128xf32>
    %31 = tpu.matmul %29, %30, %cst_8 {dimension_numbers = #tpu.dot_dimension_numbers<[1], [0], [0], [1], [0, 0, 1, 1], [], []>} : vector<8x256xf32>, vector<256x128xf32>, vector<8x128xf32> -> vector<8x128xf32>
    %c2 = arith.constant 2 : index
    %32 = memref.load %arg1[%c2] : memref<4xf32, #tpu.memory_space<smem>>
    %33 = vector.broadcast %32 : f32 to vector<8x128xf32>
    %34 = arith.mulf %33, %31 : vector<8x128xf32>
    %35 = arith.addf %24, %34 : vector<8x128xf32>
    %36 = vector.extract_strided_slice %0 {offsets = [0, 3], sizes = [8, 1], strides = [1, 1]} : vector<8x4xi32> to vector<8x1xi32>
    %37 = vector.broadcast %36 : vector<8x1xi32> to vector<8x256xi32>
    %38 = arith.cmpi eq, %37, %1 : vector<8x256xi32>
    %39 = arith.extui %38 : vector<8x256xi1> to vector<8x256xi32>
    %40 = arith.sitofp %39 : vector<8x256xi32> to vector<8x256xf32>
    %c768 = arith.constant 768 : index
    %c0_9 = arith.constant 0 : index
    %41 = vector.load %arg3[%c768, %c0_9] : memref<1024x128xf32, #tpu.memory_space<vmem>>, vector<256x128xf32>
    %cst_10 = arith.constant dense<0.000000e+00> : vector<8x128xf32>
    %42 = tpu.matmul %40, %41, %cst_10 {dimension_numbers = #tpu.dot_dimension_numbers<[1], [0], [0], [1], [0, 0, 1, 1], [], []>} : vector<8x256xf32>, vector<256x128xf32>, vector<8x128xf32> -> vector<8x128xf32>
    %c3 = arith.constant 3 : index
    %43 = memref.load %arg1[%c3] : memref<4xf32, #tpu.memory_space<smem>>
    %44 = vector.broadcast %43 : f32 to vector<8x128xf32>
    %45 = arith.mulf %44, %42 : vector<8x128xf32>
    %46 = arith.addf %35, %45 : vector<8x128xf32>
    %c0_11 = arith.constant 0 : index
    %c0_12 = arith.constant 0 : index
    %47 = vector.load %arg4[%c0_11, %c0_12] : memref<8x128xf32, #tpu.memory_space<vmem>>, vector<8x128xf32>
    tpu.vector_store %arg4[%c0_11, %c0_12], %46 {strides = array<i32>} : memref<8x128xf32, #tpu.memory_space<vmem>>, vector<8x128xf32>,
    return
  }
  func.func @transform_0(%arg0: i32) -> i32 {
    %c0_i32 = arith.constant 0 : i32
    %c0_i32_0 = arith.constant 0 : i32
    return %c0_i32 : i32
  }
  func.func @transform_1(%arg0: i32) -> (i32, i32) {
    %c0_i32 = arith.constant 0 : i32
    %c0_i32_0 = arith.constant 0 : i32
    return %arg0, %c0_i32 : i32, i32
  }
  func.func @transform_2(%arg0: i32) -> (i32, i32) {
    %c0_i32 = arith.constant 0 : i32
    %c0_i32_0 = arith.constant 0 : i32
    %c0_i32_1 = arith.constant 0 : i32
    return %c0_i32, %c0_i32_0 : i32, i32
  }
  func.func @transform_3(%arg0: i32) -> (i32, i32) {
    %c0_i32 = arith.constant 0 : i32
    %c0_i32_0 = arith.constant 0 : i32
    return %arg0, %c0_i32 : i32, i32
  }
}

</mosaic_0001>

<bundles_post_ra>
// kernel: tpu_custom_call.1
= control target key start
LH: loop header
LB: loop body
LE: loop exit
PB: predicated region body
PF: predicated region fallthrough
CT: control target
= control target key end

     0   :  { %8 = vsyncpa [#allocation5], 0  ;;  %s1292_s0 = inlined_call_operand.vmem [shape: f32[4], index: 0, kind: input, shape index: {}]   ;;  %s1293_s1 = inlined_call_operand.vmem [shape: s32[16,4], index: 1, kind: input, shape index: {}]   ;;  %s1294_s2 = inlined_call_operand.hbm [shape: f32[1024,128], index: 2, kind: input, shape index: {}]   ;;  %s1295_s3 = inlined_call_operand.hbm [shape: f32[16,128], index: 3, kind: output, shape index: {}]  }
   0x1   :  { %9 = vsyncpa [#allocation3], 0 }
   0x2   :  { %10 = vsyncpa [#allocation4], 0 }
   0x3   :  { %12 = vsyncpa [#allocation4 + $0x1], 0  ;;  %s1143_s12 = smov 0   ;;  %s1145_s13 = smov 0  }
   0x4   :  { %s1147_s14 = smov 0   ;;  %s1149_s15 = smov 0  }
   0x5 LB: > { %s1164_s16 = sadd.s32 4294967295, %s1111_s15   ;;  %s757_s17 = sadd.s32 4294967294, %s1111_s15   ;;  %s1111_s15 = sphi %s1149_s15, %s1313_s15   ;;  %s1107_s14 = sphi %s1147_s14, %s1312_s14   ;;  %s1103_s13 = sphi %s1145_s13, %s1311_s13   ;;  %s1099_s12 = sphi %s1143_s12, %s1310_s12  }
   0x6   : > { %s1168_s18 = sadd.s32 1, %s1111_s15   ;;  %s93_s19 = sadd.s32 1, %s1107_s14 }
   0x7   : > { %s90_s20 = ssub.s32 %s1111_s15, %s1168_s18  ;;  %p103_p0 = scmp.ne.s32.totalorder %s1107_s14, %s1103_s13 }
   0x8   : > { %p91_p1 = scmp.eq.s32.totalorder %s90_s20, 0  ;;  %p104_p2 = scmp.eq.s32.totalorder %s1164_s16, 1 }
   0x9   : > { %p109_p3 = scmp.ne.s32.totalorder %s1103_s13, %s1099_s12  ;;  %p110_p4 = scmp.eq.s32.totalorder %s757_s17, 1 }
   0xa   : > { %s1179_s21 = scalar_select %p91_p1, %s1107_s14, %s93_s19  }
   0xb   : > { %p1181_p5 = por %p104_p2, %p103_p0  ;;  %p1185_p6 = por %p110_p4, %p109_p3 }
   0xc   : > { %p758_p7 = scmp.ge.s32.totalorder %s1111_s15, 1  ;;  %p117_p8 = scmp.lt.s32.totalorder %s1111_s15, 3 }
   0xd   : > { %s1299_s22 = scalar_select %p1181_p5, 1, 0 }
   0xe   : > { %s1300_s23 = scalar_select %p1185_p6, 1, 0 }
   0xf   : > { %p1296_p9 = scmp.eq.s32.totalorder %s1164_s16, 0  ;;  %p1192_p10 = pnand %p758_p7, %p117_p8 }
  0x10   : > { %s130_s27 = sshll.u32 %s1292_s0, 4  ;;  %s1113_s28 = smov [#allocation6]   ;;  %s131_s27 = int_to_ptr.vmem [resolvable:$true] %s130_s27 }
  0x11   : > { %s1301_s24 = scalar_select %p1192_p10, 1, 0 }
  0x12   : > { %p940_p11 = pneg %p1192_p10  ;;  %s140_s29 = sshll.u32 %s1113_s28, 4  ;;  %s141_s29 = int_to_ptr.vmem [resolvable:$true] %s140_s29 }
  0x13   : > { %s1002_s4 = scalar_lea.vmem %s131_s27, 16  ;;  %p1010_p3 = scmp.lt.s32.totalorder %s131_s27, %s131_s27 }
  0x14   : > { %p1203_p12 = pnand %p1296_p9, %p940_p11  ;;  %p1003_p13 = scmp.ne.s32.totalorder %s131_s27, %s1002_s4 }
  0x15   : > { %p1011_p4 = scmp.lt.s32.totalorder %s1002_s4, %s1002_s4 }
  0x16   : > { %p1004_p0 = pneg %p1203_p12 }
  0x17   : > { %p1012_p7 = por %p1011_p4, %p1010_p3 }
  0x18   : > { %p1005_p1 = pnand %p1004_p0, %p1003_p13 }
  0x1a   : > { %p1006_p2 = pneg %p1005_p1 }
  0x1c   : > { %p1013_p8 = pnand %p1012_p7, %p1006_p2 }
  0x1e   : > { %1016 = shalt.err (!%p1013_p8)
}
  0x1f   : > { %s1114_s5 = smov [#allocation2]   ;;  %s1028_s6 = scalar_lea.vmem %s141_s29, 16384 }
  0x20   : > { %943 = dma.vmem_to_smem (!%p1203_p12), %s131_s27, 16, %s1114_s5, [#allocation5]  }
  0x21   : > { %p1029_p11 = scmp.ne.s32.totalorder %s141_s29, %s1028_s6  ;;  %p1036_p5 = scmp.lt.s32.totalorder %s141_s29, %s141_s29 }
  0x22   : > { %p1037_p10 = scmp.lt.s32.totalorder %s1028_s6, %s1028_s6 }
  0x23   : > { %p1031_p9 = pnand %p1029_p11, %p1004_p0 }
  0x24   : > { %p1038_p13 = por %p1037_p10, %p1036_p5 }
  0x25   : > { %p1032_p6 = pneg %p1031_p9 }
  0x27   : > { %p1039_p1 = pnand %p1038_p13, %p1032_p6 }
  0x29   : > { %1042 = shalt.err (!%p1039_p1)
}
  0x2a   : > { %s1115_s7 = smov 128   ;;  %s1116_s8 = smov 8  }
  0x2b   : > { %946 = dma.hbm_to_vmem [thread:$0]  (!%p1203_p12), %s1294_s2, 16384, %s141_s29, [#allocation3], %s1115_s7, %s1115_s7, %s1116_s8  }
  0x2c   : > { %p1303_p2 = scmp.ne.s32.totalorder %s1301_s24, 0 }
  0x2d   : > { %p1304_p3 = scmp.eq.s32.totalorder (!%p1303_p2), %s1164_s16, 0 }
  0x2e   : > { %163 = sbr.rel (%p1303_p2) target bundleno = 442 (0x1ba), region = 32 }
  0x33   : > { %1086 = dma.done.wait (%p1304_p3), [#allocation5], 16   ;;  %p1305_p9 = pmov %p1304_p3 }
  0x34   : > { %p1306_p5 = pmov %p1304_p3 }
  0x35   : > { %1088 = vsyncadd (%p1305_p9), [#allocation5], 4294967280 }
  0x36   : > { %1090 = dma.done.wait (%p1306_p5), [#allocation3], 16384   ;;  %p1307_p6 = pmov %p1304_p3 }
  0x38   : > { %1092 = vsyncadd (%p1307_p6), [#allocation3], 4294950912 }
  0x39   : > { %173 = sfence }
  0x3a   : > { %p191_p10 = scmp.lt.s32.totalorder %s1164_s16, 1  ;;  %v239_v0 = vld [vmem:[#allocation6 + $0xf8] sm:$0xff]  ;;  %v1117_v1 = vmov 0   ;;  %v1118_v2 = vmov 2   ;;  %v238_v4 = vld [vmem:[#allocation6 + $0xf0] sm:$0xff]  ;;  %v237_v7 = vld [vmem:[#allocation6 + $0xe8] sm:$0xff] }
  0x3b   : > { %997 = vset.pattern.permute.xlu0 %v1117_v1  ;;  %999 = vset.pattern.permute.xlu1 %v1118_v2  ;;  %v223_v3 = vld [vmem:[#allocation6 + $0x78] sm:$0xff]  ;;  %v222_v5 = vld [vmem:[#allocation6 + $0x70] sm:$0xff]  ;;  %v221_v11 = vld [vmem:[#allocation6 + $0x68] sm:$0xff]  ;;  %v1119_v20 = vmov 1   ;;  %v1120_v21 = vmov 3   ;;  %s775_s25 = sld [smem:[#allocation2 + $0x1]] }
  0x3c   : > { %s192_s11 = scalar_select %p191_p10, %s1164_s16, 1  ;;  %790 = vmatprep.subr.mxu0 %v239_v0  ;;  %v354_v6 = vld [vmem:[#allocation6 + $0x1f8] sm:$0xff]  ;;  %v353_v9 = vld [vmem:[#allocation6 + $0x1f0] sm:$0xff]  ;;  %v352_v12 = vld [vmem:[#allocation6 + $0x1e8] sm:$0xff] }
  0x3d   : > { %791 = vmatpush3.msra.mxu0 %v223_v3  ;;  %825 = vmatprep.subr.mxu1 %v354_v6  ;;  %v338_v8 = vld [vmem:[#allocation6 + $0x178] sm:$0xff]  ;;  %v337_v10 = vld [vmem:[#allocation6 + $0x170] sm:$0xff]  ;;  %v236_v14 = vld [vmem:[#allocation6 + $0xe0] sm:$0xff]  ;;  %s310_s26 = sld [smem:[#allocation2]]  ;;  %s188_s29 = sand.u32 1, %s1103_s13  }
  0x3e   : > { %s766_s17 = sshll.u32 %s192_s11, 3  ;;  %792 = vmatprep.subr.mxu0 %v238_v4  ;;  %826 = vmatpush3.msra.mxu1 %v338_v8  ;;  %v336_v15 = vld [vmem:[#allocation6 + $0x168] sm:$0xff]  ;;  %v220_v16 = vld [vmem:[#allocation6 + $0x60] sm:$0xff]  ;;  %v235_v18 = vld [vmem:[#allocation6 + $0xd8] sm:$0xff]  ;;  %s780_s27 = sld [smem:[#allocation2 + $0x2]] }
  0x3f   : > { %s194_s24 = scalar_lea.vmem %s1293_s1, %s766_s17  ;;  %793 = vmatpush3.msra.mxu0 %v222_v5  ;;  %827 = vmatprep.subr.mxu1 %v353_v9  ;;  %v351_v17 = vld [vmem:[#allocation6 + $0x1e0] sm:$0xff]  ;;  %v219_v22 = vld [vmem:[#allocation6 + $0x58] sm:$0xff]  ;;  %v234_v24 = vld [vmem:[#allocation6 + $0xd0] sm:$0xff]  ;;  %s785_s28 = sld [smem:[#allocation2 + $0x3]] }
  0x40   : > { %v195_v13 = vld [vmem:[%s194_s24] sm:$0xff]  ;;  %794 = vmatprep.subr.mxu0 %v237_v7  ;;  %828 = vmatpush3.msra.mxu1 %v337_v10  ;;  %v350_v23 = vld [vmem:[#allocation6 + $0x1d8] sm:$0xff]  ;;  %v218_v26 = vld [vmem:[#allocation6 + $0x50] sm:$0xff]  ;;  %v196_v7 = vlaneseq  ;;  %s765_s30 = sshll.u32 %s188_s29, 3  ;;  %s787_s4 = sshll.u32 %s1164_s16, 7 }
  0x41   : > { %200 = vperm.xlu0 %997, %v195_v13   ;;  %430 = vperm.xlu1 %999, %v195_v13   ;;  %v335_v19 = vld [vmem:[#allocation6 + $0x160] sm:$0xff]  ;;  %v334_v25 = vld [vmem:[#allocation6 + $0x158] sm:$0xff]  ;;  %v349_v27 = vld [vmem:[#allocation6 + $0x1d0] sm:$0xff]  ;;  %s190_s5 = scalar_lea.vmem [#allocation7], %s765_s30  ;;  %s672_s9 = scalar_lea.hbm %s1295_s3, %s787_s4 }
  0x42   : > { %795 = vmatpush3.msra.mxu0 %v221_v11  ;;  %829 = vmatprep.subr.mxu1 %v352_v12  ;;  %v233_v28 = vld [vmem:[#allocation6 + $0xc8] sm:$0xff]  ;;  %v333_v29 = vld [vmem:[#allocation6 + $0x150] sm:$0xff]  ;;  %v232_v32 = vld [vmem:[#allocation6 + $0xc0] sm:$0xff]  ;;  %v1233_v8 = vand.u32 127, %v196_v7  ;;  %s674_s6 = sshll.u32 %s190_s5, 4  ;;  %s661_s10 = scalar_lea.sflag [#allocation4], %s188_s29  ;;  %s675_s6 = int_to_ptr.vmem [resolvable:$true] %s674_s6 }
  0x43   : > { %796 = vmatprep.subr.mxu0 %v236_v14  ;;  %830 = vmatpush3.msra.mxu1 %v336_v15  ;;  %v217_v30 = vld [vmem:[#allocation6 + $0x48] sm:$0xff]  ;;  %v216_v34 = vld [vmem:[#allocation6 + $0x40] sm:$0xff]  ;;  %v231_v36 = vld [vmem:[#allocation6 + $0xb8] sm:$0xff]  ;;  %s1043_s11 = scalar_lea.vmem %s675_s6, 128  ;;  %p1308_p0 = scmp.ne.s32.totalorder %s1299_s22, 0 }
  0x44   : > { %797 = vmatpush3.msra.mxu0 %v220_v16  ;;  %831 = vmatprep.subr.mxu1 %v351_v17  ;;  %v348_v31 = vld [vmem:[#allocation6 + $0x1c8] sm:$0xff]  ;;  %v347_v35 = vld [vmem:[#allocation6 + $0x1c0] sm:$0xff]  ;;  %v215_v38 = vld [vmem:[#allocation6 + $0x38] sm:$0xff]  ;;  %v1236_v9 = vadd.s32 128, %v1233_v8  ;;  %p1044_p12 = scmp.ne.s32.totalorder %s675_s6, %s1043_s11  ;;  %s1122_s17 = smov [#allocation7]  }
  0x45   : > { %998 = vset.pattern.permute.xlu0 %v1119_v20  ;;  %1000 = vset.pattern.permute.xlu1 %v1120_v21  ;;  %v332_v33 = vld [vmem:[#allocation6 + $0x148] sm:$0xff]  ;;  %v331_v37 = vld [vmem:[#allocation6 + $0x140] sm:$0xff]  ;;  %v346_v39 = vld [vmem:[#allocation6 + $0x1b8] sm:$0xff]  ;;  %s1047_s19 = sshll.u32 %s1122_s17, 4  ;;  %s1048_s19 = int_to_ptr.vmem [resolvable:$false] %s1047_s19 }
  0x46   : > { %315 = vperm.xlu0 %998, %v195_v13   ;;  %545 = vperm.xlu1 %1000, %v195_v13   ;;  %v230_v40 = vld [vmem:[#allocation6 + $0xb0] sm:$0xff]  ;;  %v330_v41 = vld [vmem:[#allocation6 + $0x138] sm:$0xff]  ;;  %v229_v44 = vld [vmem:[#allocation6 + $0xa8] sm:$0xff]  ;;  %v1121_v13 = vmov 1.0   ;;  %p1045_p4 = pnand %p1044_p12, %p1308_p0  ;;  %s1049_s16 = scalar_lea.vmem %s1048_s19, 256 }
  0x47   : > { %798 = vmatprep.subr.mxu0 %v235_v18  ;;  %832 = vmatpush3.msra.mxu1 %v335_v19  ;;  %v214_v42 = vld [vmem:[#allocation6 + $0x30] sm:$0xff]  ;;  %v213_v46 = vld [vmem:[#allocation6 + $0x28] sm:$0xff]  ;;  %v228_v48 = vld [vmem:[#allocation6 + $0xa0] sm:$0xff]  ;;  %p1050_p8 = scmp.lt.s32.totalorder %s675_s6, %s1048_s19  ;;  %p1051_p11 = scmp.lt.s32.totalorder %s1049_s16, %s1043_s11 }
  0x48   : > { %799 = vmatpush3.msra.mxu0 %v219_v22  ;;  %833 = vmatprep.subr.mxu1 %v350_v23  ;;  %v345_v43 = vld [vmem:[#allocation6 + $0x1b0] sm:$0xff]  ;;  %v344_v47 = vld [vmem:[#allocation6 + $0x1a8] sm:$0xff]  ;;  %v212_v50 = vld [vmem:[#allocation6 + $0x20] sm:$0xff]  ;;  %p1046_p7 = pneg %p1045_p4 }
  0x49   : > { %800 = vmatprep.subr.mxu0 %v234_v24  ;;  %834 = vmatpush3.msra.mxu1 %v334_v25  ;;  %v329_v45 = vld [vmem:[#allocation6 + $0x130] sm:$0xff]  ;;  %v328_v49 = vld [vmem:[#allocation6 + $0x128] sm:$0xff]  ;;  %v343_v51 = vld [vmem:[#allocation6 + $0x1a0] sm:$0xff]  ;;  %p1052_p13 = por %p1051_p11, %p1050_p8 }
  0x4a   : > { %801 = vmatpush3.msra.mxu0 %v218_v26  ;;  %835 = vmatprep.subr.mxu1 %v349_v27  ;;  %v227_v52 = vld [vmem:[#allocation6 + $0x98] sm:$0xff]  ;;  %v327_v53 = vld [vmem:[#allocation6 + $0x120] sm:$0xff]  ;;  %v226_v56 = vld [vmem:[#allocation6 + $0x90] sm:$0xff] }
  0x4b   : > { %802 = vmatprep.subr.mxu0 %v233_v28  ;;  %836 = vmatpush3.msra.mxu1 %v333_v29  ;;  %v211_v54 = vld [vmem:[#allocation6 + $0x18] sm:$0xff]  ;;  %v210_v58 = vld [vmem:[#allocation6 + $0x10] sm:$0xff]  ;;  %v225_v60 = vld [vmem:[#allocation6 + $0x88] sm:$0xff]  ;;  %p1053_p1 = pnand %p1052_p13, %p1046_p7 }
  0x4c   : > { %803 = vmatpush3.msra.mxu0 %v217_v30  ;;  %837 = vmatprep.subr.mxu1 %v348_v31  ;;  %v342_v55 = vld [vmem:[#allocation6 + $0x198] sm:$0xff]  ;;  %v341_v59 = vld [vmem:[#allocation6 + $0x190] sm:$0xff]  ;;  %v209_v62 = vld [vmem:[#allocation6 + $0x8] sm:$0xff] }
  0x4d   : > { %804 = vmatprep.subr.mxu0 %v232_v32  ;;  %838 = vmatpush3.msra.mxu1 %v332_v33  ;;  %v326_v57 = vld [vmem:[#allocation6 + $0x118] sm:$0xff]  ;;  %v325_v61 = vld [vmem:[#allocation6 + $0x110] sm:$0xff]  ;;  %v340_v63 = vld [vmem:[#allocation6 + $0x188] sm:$0xff] }
  0x4e   : > { %805 = vmatpush3.msra.mxu0 %v216_v34  ;;  %839 = vmatprep.subr.mxu1 %v347_v35  ;;  %v224_v0 = vld [vmem:[#allocation6 + $0x80] sm:$0xff]  ;;  %v324_v1 = vld [vmem:[#allocation6 + $0x108] sm:$0xff]  ;;  %v469_v4 = vld [vmem:[#allocation6 + $0x2f8] sm:$0xff] }
  0x4f   : > { %806 = vmatprep.subr.mxu0 %v231_v36  ;;  %840 = vmatpush3.msra.mxu1 %v331_v37  ;;  %v208_v2 = vld [vmem:[#allocation6] sm:$0xff]  ;;  %v584_v6 = vld [vmem:[#allocation6 + $0x3f8] sm:$0xff]  ;;  %v468_v14 = vld [vmem:[#allocation6 + $0x2f0] sm:$0xff] }
  0x50   : > { %807 = vmatpush3.msra.mxu0 %v215_v38  ;;  %841 = vmatprep.subr.mxu1 %v346_v39  ;;  %v339_v3 = vld [vmem:[#allocation6 + $0x180] sm:$0xff]  ;;  %v453_v12 = vld [vmem:[#allocation6 + $0x278] sm:$0xff]  ;;  %v452_v15 = vld [vmem:[#allocation6 + $0x270] sm:$0xff] }
  0x51   : > { %808 = vmatprep.subr.mxu0 %v230_v40  ;;  %842 = vmatpush3.msra.mxu1 %v330_v41  ;;  %v323_v5 = vld [vmem:[#allocation6 + $0x100] sm:$0xff]  ;;  %v467_v16 = vld [vmem:[#allocation6 + $0x2e8] sm:$0xff]  ;;  %v568_v20 = vld [vmem:[#allocation6 + $0x378] sm:$0xff] }
  0x52   : > { %809 = vmatpush3.msra.mxu0 %v214_v42  ;;  %843 = vmatprep.subr.mxu1 %v345_v43  ;;  %v451_v18 = vld [vmem:[#allocation6 + $0x268] sm:$0xff]  ;;  %v466_v19 = vld [vmem:[#allocation6 + $0x2e0] sm:$0xff]  ;;  %v583_v22 = vld [vmem:[#allocation6 + $0x3f0] sm:$0xff] }
  0x53   : > { %810 = vmatprep.subr.mxu0 %v229_v44  ;;  %844 = vmatpush3.msra.mxu1 %v329_v45  ;;  %v465_v23 = vld [vmem:[#allocation6 + $0x2d8] sm:$0xff]  ;;  %v567_v24 = vld [vmem:[#allocation6 + $0x370] sm:$0xff]  ;;  %v582_v26 = vld [vmem:[#allocation6 + $0x3e8] sm:$0xff] }
  0x54   : > { %811 = vmatpush3.msra.mxu0 %v213_v46  ;;  %845 = vmatprep.subr.mxu1 %v344_v47  ;;  %v449_v25 = vld [vmem:[#allocation6 + $0x258] sm:$0xff]  ;;  %v464_v27 = vld [vmem:[#allocation6 + $0x2d0] sm:$0xff]  ;;  %v566_v28 = vld [vmem:[#allocation6 + $0x368] sm:$0xff] }
  0x55   : > { %812 = vmatprep.subr.mxu0 %v228_v48  ;;  %846 = vmatpush3.msra.mxu1 %v328_v49  ;;  %v448_v29 = vld [vmem:[#allocation6 + $0x250] sm:$0xff]  ;;  %v581_v30 = vld [vmem:[#allocation6 + $0x3e0] sm:$0xff]  ;;  %v463_v31 = vld [vmem:[#allocation6 + $0x2c8] sm:$0xff] }
  0x56   : > { %813 = vmatpush3.msra.mxu0 %v212_v50  ;;  %847 = vmatprep.subr.mxu1 %v343_v51  ;;  %v565_v32 = vld [vmem:[#allocation6 + $0x360] sm:$0xff]  ;;  %v447_v33 = vld [vmem:[#allocation6 + $0x248] sm:$0xff]  ;;  %v580_v34 = vld [vmem:[#allocation6 + $0x3d8] sm:$0xff] }
  0x57   : > { %814 = vmatprep.subr.mxu0 %v227_v52  ;;  %848 = vmatpush3.msra.mxu1 %v327_v53  ;;  %v462_v35 = vld [vmem:[#allocation6 + $0x2c0] sm:$0xff]  ;;  %v564_v36 = vld [vmem:[#allocation6 + $0x358] sm:$0xff]  ;;  %v579_v38 = vld [vmem:[#allocation6 + $0x3d0] sm:$0xff] }
  0x58   : > { %815 = vmatpush3.msra.mxu0 %v211_v54  ;;  %849 = vmatprep.subr.mxu1 %v342_v55  ;;  %v446_v37 = vld [vmem:[#allocation6 + $0x240] sm:$0xff]  ;;  %v461_v39 = vld [vmem:[#allocation6 + $0x2b8] sm:$0xff]  ;;  %v563_v40 = vld [vmem:[#allocation6 + $0x350] sm:$0xff] }
  0x59   : > { %816 = vmatprep.subr.mxu0 %v226_v56  ;;  %850 = vmatpush3.msra.mxu1 %v326_v57  ;;  %v445_v41 = vld [vmem:[#allocation6 + $0x238] sm:$0xff]  ;;  %v578_v42 = vld [vmem:[#allocation6 + $0x3c8] sm:$0xff]  ;;  %v460_v43 = vld [vmem:[#allocation6 + $0x2b0] sm:$0xff] }
  0x5a   : > { %817 = vmatpush3.msra.mxu0 %v210_v58  ;;  %851 = vmatprep.subr.mxu1 %v341_v59  ;;  %v562_v44 = vld [vmem:[#allocation6 + $0x348] sm:$0xff]  ;;  %v444_v45 = vld [vmem:[#allocation6 + $0x230] sm:$0xff]  ;;  %v577_v46 = vld [vmem:[#allocation6 + $0x3c0] sm:$0xff] }
  0x5b   : > { %818 = vmatprep.subr.mxu0 %v225_v60  ;;  %852 = vmatpush3.msra.mxu1 %v325_v61  ;;  %v459_v47 = vld [vmem:[#allocation6 + $0x2a8] sm:$0xff]  ;;  %v561_v48 = vld [vmem:[#allocation6 + $0x340] sm:$0xff]  ;;  %v576_v50 = vld [vmem:[#allocation6 + $0x3b8] sm:$0xff] }
  0x5c   : > { %819 = vmatpush3.msra.mxu0 %v209_v62  ;;  %853 = vmatprep.subr.mxu1 %v340_v63  ;;  %v443_v49 = vld [vmem:[#allocation6 + $0x228] sm:$0xff]  ;;  %v458_v51 = vld [vmem:[#allocation6 + $0x2a0] sm:$0xff]  ;;  %v560_v52 = vld [vmem:[#allocation6 + $0x338] sm:$0xff] }
  0x5d   : > { %820 = vmatprep.subr.mxu0 %v224_v0  ;;  %854 = vmatpush3.msra.mxu1 %v324_v1  ;;  %v442_v53 = vld [vmem:[#allocation6 + $0x220] sm:$0xff]  ;;  %v575_v54 = vld [vmem:[#allocation6 + $0x3b0] sm:$0xff]  ;;  %v457_v55 = vld [vmem:[#allocation6 + $0x298] sm:$0xff] }
  0x5e   : > { %821 = vmatpush3.msra.mxu0 %v208_v2  ;;  %855 = vmatprep.subr.mxu1 %v339_v3  ;;  %v559_v56 = vld [vmem:[#allocation6 + $0x330] sm:$0xff]  ;;  %v441_v57 = vld [vmem:[#allocation6 + $0x218] sm:$0xff]  ;;  %v574_v58 = vld [vmem:[#allocation6 + $0x3a8] sm:$0xff] }
  0x5f   : > { %860 = vmatprep.subr.mxu0 %v469_v4  ;;  %856 = vmatpush3.msra.mxu1 %v323_v5  ;;  %v456_v59 = vld [vmem:[#allocation6 + $0x290] sm:$0xff]  ;;  %v558_v60 = vld [vmem:[#allocation6 + $0x328] sm:$0xff]  ;;  %v573_v62 = vld [vmem:[#allocation6 + $0x3a0] sm:$0xff] }
  0x60   : > { %895 = vmatprep.subr.mxu1 %v584_v6  ;;  %1001 = vset.pattern.permute.xlu0 %v1120_v21  ;;  %v450_v21 = vld [vmem:[#allocation6 + $0x260] sm:$0xff]  ;;  %v440_v61 = vld [vmem:[#allocation6 + $0x210] sm:$0xff]  ;;  %v455_v63 = vld [vmem:[#allocation6 + $0x288] sm:$0xff] }
  0x61   : > { %v557_v0 = vld [vmem:[#allocation6 + $0x320] sm:$0xff]  ;;  %v439_v1 = vld [vmem:[#allocation6 + $0x208] sm:$0xff]  ;;  %v572_v2 = vld [vmem:[#allocation6 + $0x398] sm:$0xff] }
  0x62   : > { %v454_v3 = vld [vmem:[#allocation6 + $0x280] sm:$0xff]  ;;  %v556_v4 = vld [vmem:[#allocation6 + $0x318] sm:$0xff]  ;;  %v571_v7 = vld [vmem:[#allocation6 + $0x390] sm:$0xff] }
  0x63   : > { %v438_v6 = vld [vmem:[#allocation6 + $0x200] sm:$0xff] }
  0xbc   : > { %v201_v10 = vpop.permute.xlu0 %200  ;;  %v1238_v11 = vpop.permute.xlu1 %430 }
  0xbd   : > { %vm202_vm0 = vcmp.eq.s32.totalorder %v201_v10, %v1233_v8  ;;  %vm203_vm1 = vcmp.eq.s32.totalorder %v201_v10, %v1236_v9  ;;  %vm433_vm2 = vcmp.eq.s32.totalorder %v1238_v11, %v1236_v9  ;;  %vm432_vm5 = vcmp.eq.s32.totalorder %v1238_v11, %v1233_v8  ;;  %v555_v10 = vld [vmem:[#allocation6 + $0x310] sm:$0xff] }
  0xbe   : > { %769 = vmatprep.mubr.msk.f32.mxu0 %vm203_vm1, %v1121_v13 }
  0xbf   : > { %770 = vmatmul.mubr.msk.f32.vlgmr.msra.gmra.mxu0 %vm202_vm0, %v1121_v13 }
  0xc0   : > { %861 = vmatpush3.msra.mxu0 %v453_v12  ;;  %778 = vmatprep.mubr.msk.f32.mxu0 %vm433_vm2, %v1121_v13  ;;  %v570_v12 = vld [vmem:[#allocation6 + $0x388] sm:$0xff] }
  0xc1   : > { %862 = vmatprep.subr.mxu0 %v468_v14  ;;  %v316_v17 = vpop.permute.xlu0 %315  ;;  %v546_v5 = vpop.permute.xlu1 %545  ;;  %v554_v14 = vld [vmem:[#allocation6 + $0x308] sm:$0xff] }
  0xc2   : > { %863 = vmatpush3.msra.mxu0 %v452_v15  ;;  %vm317_vm3 = vcmp.eq.s32.totalorder %v316_v17, %v1233_v8  ;;  %vm318_vm4 = vcmp.eq.s32.totalorder %v316_v17, %v1236_v9  ;;  %vm548_vm6 = vcmp.eq.s32.totalorder %v546_v5, %v1236_v9  ;;  %v569_v15 = vld [vmem:[#allocation6 + $0x380] sm:$0xff]  ;;  %vm547_vm7 = vcmp.eq.s32.totalorder %v546_v5, %v1233_v8 }
  0xc3   : > { %864 = vmatprep.subr.mxu0 %v467_v16  ;;  %773 = vmatprep.mubr.msk.f32.mxu1 %vm318_vm4, %v1121_v13  ;;  %v553_v16 = vld [vmem:[#allocation6 + $0x300] sm:$0xff] }
  0xc4   : > { %865 = vmatpush3.msra.mxu0 %v451_v18  ;;  %774 = vmatmul.mubr.msk.f32.vlgmr.msra.gmra.mxu1 %vm317_vm3, %v1121_v13 }
  0xc5   : > { %866 = vmatprep.subr.mxu0 %v466_v19  ;;  %896 = vmatpush3.msra.mxu1 %v568_v20 }
  0xc6   : > { %867 = vmatpush3.msra.mxu0 %v450_v21  ;;  %897 = vmatprep.subr.mxu1 %v583_v22  ;;  %v426_v21 = vstv %s775_s25 }
  0xc7   : > { %868 = vmatprep.subr.mxu0 %v465_v23  ;;  %898 = vmatpush3.msra.mxu1 %v567_v24  ;;  %v311_v23 = vstv %s310_s26 }
  0xc8   : > { %869 = vmatpush3.msra.mxu0 %v449_v25  ;;  %899 = vmatprep.subr.mxu1 %v582_v26  ;;  %v541_v25 = vstv %s780_s27 }
  0xc9   : > { %870 = vmatprep.subr.mxu0 %v464_v27  ;;  %900 = vmatpush3.msra.mxu1 %v566_v28 }
  0xca   : > { %871 = vmatpush3.msra.mxu0 %v448_v29  ;;  %901 = vmatprep.subr.mxu1 %v581_v30  ;;  %v656_v30 = vstv %s785_s28 }
  0xcb   : > { %872 = vmatprep.subr.mxu0 %v463_v31  ;;  %902 = vmatpush3.msra.mxu1 %v565_v32 }
  0xcc   : > { %873 = vmatpush3.msra.mxu0 %v447_v33  ;;  %903 = vmatprep.subr.mxu1 %v580_v34 }
  0xcd   : > { %874 = vmatprep.subr.mxu0 %v462_v35  ;;  %904 = vmatpush3.msra.mxu1 %v564_v36 }
  0xce   : > { %875 = vmatpush3.msra.mxu0 %v446_v37  ;;  %905 = vmatprep.subr.mxu1 %v579_v38 }
  0xcf   : > { %876 = vmatprep.subr.mxu0 %v461_v39  ;;  %906 = vmatpush3.msra.mxu1 %v563_v40 }
  0xd0   : > { %877 = vmatpush3.msra.mxu0 %v445_v41  ;;  %907 = vmatprep.subr.mxu1 %v578_v42 }
  0xd1   : > { %878 = vmatprep.subr.mxu0 %v460_v43  ;;  %908 = vmatpush3.msra.mxu1 %v562_v44 }
  0xd2   : > { %879 = vmatpush3.msra.mxu0 %v444_v45  ;;  %909 = vmatprep.subr.mxu1 %v577_v46 }
  0xd3   : > { %880 = vmatprep.subr.mxu0 %v459_v47  ;;  %910 = vmatpush3.msra.mxu1 %v561_v48 }
  0xd4   : > { %881 = vmatpush3.msra.mxu0 %v443_v49  ;;  %911 = vmatprep.subr.mxu1 %v576_v50 }
  0xd5   : > { %882 = vmatprep.subr.mxu0 %v458_v51  ;;  %912 = vmatpush3.msra.mxu1 %v560_v52 }
  0xd6   : > { %883 = vmatpush3.msra.mxu0 %v442_v53  ;;  %913 = vmatprep.subr.mxu1 %v575_v54 }
  0xd7   : > { %884 = vmatprep.subr.mxu0 %v457_v55  ;;  %914 = vmatpush3.msra.mxu1 %v559_v56 }
  0xd8   : > { %885 = vmatpush3.msra.mxu0 %v441_v57  ;;  %915 = vmatprep.subr.mxu1 %v574_v58 }
  0xd9   : > { %886 = vmatprep.subr.mxu0 %v456_v59  ;;  %916 = vmatpush3.msra.mxu1 %v558_v60 }
  0xda   : > { %887 = vmatpush3.msra.mxu0 %v440_v61  ;;  %917 = vmatprep.subr.mxu1 %v573_v62 }
  0xdb   : > { %888 = vmatprep.subr.mxu0 %v455_v63  ;;  %918 = vmatpush3.msra.mxu1 %v557_v0 }
  0xdc   : > { %889 = vmatpush3.msra.mxu0 %v439_v1  ;;  %919 = vmatprep.subr.mxu1 %v572_v2 }
  0xdd   : > { %890 = vmatprep.subr.mxu0 %v454_v3  ;;  %920 = vmatpush3.msra.mxu1 %v556_v4 }
  0xde   : > { %891 = vmatpush3.msra.mxu0 %v438_v6  ;;  %921 = vmatprep.subr.mxu1 %v571_v7 }
  0xdf   : > { %779 = vmatmul.mubr.msk.f32.vlgmr.msra.gmra.mxu0 %vm432_vm5, %v1121_v13  ;;  %922 = vmatpush3.msra.mxu1 %v555_v10 }
  0xe0   : > { %923 = vmatprep.subr.mxu1 %v570_v12  ;;  %783 = vmatprep.mubr.msk.f32.mxu1 %vm548_vm6, %v1121_v13 }
  0xe1   : > { %924 = vmatpush3.msra.mxu1 %v554_v14 }
  0xe2   : > { %925 = vmatprep.subr.mxu1 %v569_v15 }
  0xe3   : > { %926 = vmatpush3.msra.mxu1 %v553_v16 }
  0xe4   : > { %784 = vmatmul.mubr.msk.f32.vlgmr.msra.gmra.mxu1 %vm547_vm7, %v1121_v13 }
 0x17f   : > { %v822_v11 = vpop.f32.mrf.mxu0 }
 0x181   : > { %v823_v18 = vpop.f32.mrf.mxu0 }
 0x182   : > { %v824_v22 = vadd.f32 %v823_v18, %v822_v11 }
 0x184   : > { %v857_v9 = vpop.f32.mrf.mxu1  ;;  %v312_v27 = vmul.f32 %v824_v22, %v311_v23 }
 0x186   : > { %v858_v17 = vpop.f32.mrf.mxu1 }
 0x187   : > { %v859_v19 = vadd.f32 %v858_v17, %v857_v9 }
 0x189   : > { %v427_v13 = vmul.f32 %v859_v19, %v426_v21 }
 0x18b   : > { %v428_v31 = vadd.f32 %v427_v13, %v312_v27 }
 0x19f   : > { %v892_v20 = vpop.f32.mrf.mxu0 }
 0x1a1   : > { %v893_v8 = vpop.f32.mrf.mxu0 }
 0x1a2   : > { %v894_v24 = vadd.f32 %v893_v8, %v892_v20 }
 0x1a4   : > { %v927_v26 = vpop.f32.mrf.mxu1  ;;  %v542_v28 = vmul.f32 %v894_v24, %v541_v25 }
 0x1a6   : > { %v928_v29 = vpop.f32.mrf.mxu1  ;;  %v543_v33 = vadd.f32 %v542_v28, %v428_v31 }
 0x1a7   : > { %v929_v32 = vadd.f32 %v928_v29, %v927_v26 }
 0x1a9   : > { %v657_v34 = vmul.f32 %v929_v32, %v656_v30 }
 0x1ab   : > { %v658_v35 = vadd.f32 %v657_v34, %v543_v33 }
 0x1ad   : > { %659 = vst [vmem:[%s190_s5] sm:$0xff] %v658_v35 }
 0x1ae   : > { %1056 = shalt.err (!%p1053_p1)
}
 0x1af   : > { %s1057_s20 = scalar_lea.hbm %s672_s9, 128  ;;  %s1061_s26 = scalar_lea.hbm %s1295_s3, 256 }
 0x1b0   : > { %p1058_p2 = scmp.ne.s32.totalorder %s672_s9, %s1057_s20  ;;  %p1062_p5 = scmp.lt.s32.totalorder %s672_s9, %s1295_s3 }
 0x1b1   : > { %p1063_p6 = scmp.lt.s32.totalorder %s1061_s26, %s1057_s20 }
 0x1b2   : > { %p1059_p3 = pnand %p1058_p2, %p1308_p0 }
 0x1b3   : > { %p1064_p10 = por %p1063_p6, %p1062_p5 }
 0x1b4   : > { %p1060_p9 = pneg %p1059_p3 }
 0x1b6   : > { %p1065_p12 = pnand %p1064_p10, %p1060_p9 }
 0x1b8   : > { %1068 = shalt.err (!%p1065_p12)
}
 0x1b9   : > { %938 = dma.vmem_to_hbm [thread:$0]  (%p1308_p0), %s675_s6, 128, %s672_s9, %s661_s10  }
 0x1ba PF: > { %p955_p4 = scmp.ge.s32.totalorder %s1111_s15, 2  ;;  %s686_s29 = sand.u32 1, %s1099_s12  }
 0x1bb   : > { %p1309_p7 = scmp.ne.s32.totalorder %s1300_s23, 0  ;;  %s687_s30 = scalar_lea.sflag [#allocation4], %s686_s29 }
 0x1bd   : > { %p948_p8 = pnand %p955_p4, %p1309_p7 }
 0x1bf   : > { %p949_p11 = pneg %p948_p8 }
 0x1c1   : > { %1094 = dma.done.wait (%p949_p11), %s687_s30, 128  }
 0x1c2   : > { %1096 = vsyncadd (%p949_p11), %s687_s30, 4294967168  ;;  %p15_p13 = scmp.ge.s32.totalorder %s1168_s18, 4   ;;  %s1310_s12 = smov %s1103_s13 }
 0x1c3   : > { %s1311_s13 = smov %s1107_s14  ;;  %s1312_s14 = smov %s1179_s21 }
 0x1c4   : > { %s1313_s15 = smov %s1168_s18  ;;  %17 = sbr.rel (!%p15_p13) target bundleno = 5 (0x5), region = 77 }
 0x1c9   :  { %692 = vsyncpa [#allocation3], 1 }
 0x1ca   :  { %694 = vsyncpa [#allocation3 + $0x1], 1 }
 0x1cb   :  { %695 = vsyncpa [#allocation4], 1 }
 0x1cc   :  { %697 = vsyncpa [#allocation4 + $0x1], 1 }
 0x1cd   :  { %698 = vsyncpa [#allocation5], 1 }
 0x1ce   :  { %700 = vsyncpa [#allocation5 + $0x1], 1 }

</bundles_post_ra>
